<compile_context>
chip_gen: v7x
topology: tpu7x:2x2x1
jax: 0.10.0
libtpu: 0.0.40
codegen_flags: <defaults>
</compile_context>

<pallas_src>
import functools

import jax
import jax.numpy as jnp
from jax import lax
from jax.experimental import pallas as pl
from jax.experimental.pallas import tpu as pltpu


_LANE = 128
# Per-block byte budget. Double-buffered input + double-buffered output ~= 4x this,
# i.e. ~8 MiB resident: fits v5e's 16 MiB scoped VMEM default, v6e's 32 MiB, and
# v7x's 32 MiB scoped / 64 MiB physical without touching vmem_limit_bytes.
_MAX_BLOCK_BYTES = 2 << 20


# ----------------------------- Pallas kernel -----------------------------

def _layernorm_proxy_kernel(x_ref, g_ref, b_ref, o_ref, *, eps):
    # x_ref: (1, C, hwt)   g_ref / b_ref: (C, 1)   o_ref: (1, C, hwt)
    # Channels on sublanes, pixels on lanes -> per-pixel reduction over axis 0 (sublanes).
    x = x_ref[0].astype(jnp.float32)                      # f32 statistics
    mean = jnp.mean(x, axis=0, keepdims=True)             # (1, hwt)
    xc = x - mean
    var = jnp.mean(xc * xc, axis=0, keepdims=True)        # biased variance == nn.LayerNorm
    xn = xc * lax.rsqrt(var + eps)                        # rsqrt -> EUP slot
    y = xn * g_ref[...].astype(jnp.float32) + b_ref[...].astype(jnp.float32)
    o_ref[0] = y.astype(o_ref.dtype)                      # lane-dense (unmasked) store


# ----------------------------- tiling helpers -----------------------------

def _pick_hw_tile(hw_padded, c, itemsize, batch):
    """Largest multiple of 128 dividing hw_padded with C*hwt*itemsize <= budget."""
    max_lanes = max(_LANE, ((_MAX_BLOCK_BYTES // (c * itemsize)) // _LANE) * _LANE)
    best = _LANE
    t = _LANE
    while t <= hw_padded:
        if hw_padded % t == 0 and t <= max_lanes:
            best = t
        t += _LANE
    # v7x has 2 TensorCores: make sure the grid has >= 2 total steps when possible.
    while batch * (hw_padded // best) < 2 and best > _LANE:
        half = best // 2
        if half % _LANE == 0 and hw_padded % half == 0:
            best = half
        else:
            break
    return best


# ----------------------------- wrapper -----------------------------

def layernorm_proxy(x, gamma, beta, *, eps=1e-5):
    """LayerNormProxy forward: LayerNorm over the channel dim of an NCHW tensor.

    x: (B, C, H, W); gamma/beta: (C,).  Returns (B, C, H, W) in x.dtype.
    """
    B, C, H, W = x.shape
    HW = H * W
    x_flat = x.reshape(B, C, HW)                 # contiguous reshape, no data movement

    # Pad the flattened spatial axis up to a multiple of 128 so every store is a
    # lane-dense unmasked vst; padded columns are independent pixels, sliced off below.
    HW_pad = ((HW + _LANE - 1) // _LANE) * _LANE
    if HW_pad != HW:
        x_flat = jnp.pad(x_flat, ((0, 0), (0, 0), (0, HW_pad - HW)))

    itemsize = jnp.dtype(x.dtype).itemsize
    hwt = _pick_hw_tile(HW_pad, C, itemsize, B)
    grid = (B, HW_pad // hwt)

    g2 = gamma.reshape(C, 1)
    b2 = beta.reshape(C, 1)

    out = pl.pallas_call(
        functools.partial(_layernorm_proxy_kernel, eps=eps),
        out_shape=jax.ShapeDtypeStruct((B, C, HW_pad), x.dtype),
        grid_spec=pltpu.PrefetchScalarGridSpec(
            num_scalar_prefetch=0,
            grid=grid,
            in_specs=[
                pl.BlockSpec((1, C, hwt), lambda b, j: (b, 0, j)),
                pl.BlockSpec((C, 1), lambda b, j: (0, 0)),
                pl.BlockSpec((C, 1), lambda b, j: (0, 0)),
            ],
            out_specs=pl.BlockSpec((1, C, hwt), lambda b, j: (b, 0, j)),
        ),
        compiler_params=pltpu.CompilerParams(
            dimension_semantics=("parallel", "parallel"),
        ),
    )(x_flat, g2, b2)

    if HW_pad != HW:
        out = out[:, :, :HW]
    return out.reshape(B, C, H, W)


# ----------------------------- pure-JAX reference -----------------------------

def layernorm_proxy_ref(x, gamma, beta, *, eps=1e-5):
    # Mirrors the PyTorch module: b c h w -> b h w c, LayerNorm(C), back to b c h w.
    xt = jnp.transpose(x, (0, 2, 3, 1)).astype(jnp.float32)
    mean = jnp.mean(xt, axis=-1, keepdims=True)
    var = jnp.mean((xt - mean) ** 2, axis=-1, keepdims=True)
    xn = (xt - mean) * lax.rsqrt(var + eps)
    y = xn * gamma.astype(jnp.float32) + beta.astype(jnp.float32)
    return jnp.transpose(y, (0, 3, 1, 2)).astype(x.dtype)


if __name__ == "__main__":
    key = jax.random.PRNGKey(0)
    fwd = jax.jit(layernorm_proxy)

    # Case 1: f32, HW a multiple of 128 (lane-dense path, no padding).
    B, C, H, W = 2, 32, 16, 16
    kx, kg, kb = jax.random.split(key, 3)
    x = jax.random.normal(kx, (B, C, H, W), jnp.float32)
    gamma = 1.0 + 0.1 * jax.random.normal(kg, (C,), jnp.float32)
    beta = 0.1 * jax.random.normal(kb, (C,), jnp.float32)
    y = fwd(x, gamma, beta)
    jax.block_until_ready(y)
    assert y.shape == (B, C, H, W), y.shape
    assert bool(jnp.all(jnp.isfinite(y)))
    y_ref = layernorm_proxy_ref(x, gamma, beta)
    assert bool(jnp.allclose(y, y_ref, atol=1e-5, rtol=1e-5)), \
        float(jnp.max(jnp.abs(y - y_ref)))

    # Case 2: bf16 activations (f32 statistics inside the kernel), HW multiple of 128.
    xb = x.astype(jnp.bfloat16)
    yb = fwd(xb, gamma, beta)
    jax.block_until_ready(yb)
    assert yb.dtype == jnp.bfloat16
    yb_ref = layernorm_proxy_ref(xb, gamma, beta)
    assert bool(jnp.allclose(yb.astype(jnp.float32), yb_ref.astype(jnp.float32),
                             atol=3e-2, rtol=3e-2))

    # Case 3: HW NOT a multiple of 128 (14x14 = 196) -> padded lane-dense path.
    B3, C3, H3, W3 = 2, 4, 14, 14
    kx3, kg3, kb3 = jax.random.split(jax.random.PRNGKey(1), 3)
    x3 = jax.random.normal(kx3, (B3, C3, H3, W3), jnp.float32)
    g3 = 1.0 + 0.1 * jax.random.normal(kg3, (C3,), jnp.float32)
    b3 = 0.1 * jax.random.normal(kb3, (C3,), jnp.float32)
    y3 = jax.jit(layernorm_proxy)(x3, g3, b3)
    jax.block_until_ready(y3)
    y3_ref = layernorm_proxy_ref(x3, g3, b3)
    assert y3.shape == (B3, C3, H3, W3)
    assert bool(jnp.allclose(y3, y3_ref, atol=1e-5, rtol=1e-5)), \
        float(jnp.max(jnp.abs(y3 - y3_ref)))

    print("KERNEL_OK")
</pallas_src>

<mosaic_0001>
module attributes {stable_mosaic.version = 11 : i64} {
  func.func @_layernorm_proxy_kernel(%arg0: i32, %arg1: i32, %arg2: memref<1x32x256xf32, #tpu.memory_space<vmem>>, %arg3: memref<32x1xf32, #tpu.memory_space<vmem>>, %arg4: memref<32x1xf32, #tpu.memory_space<vmem>>, %arg5: memref<1x32x256xf32, #tpu.memory_space<vmem>>) attributes {dimension_semantics = [#tpu.dimension_semantics<parallel>, #tpu.dimension_semantics<parallel>], iteration_bounds = array<i64: 2, 1>, scalar_prefetch = 0 : i64, scratch_operands = 0 : i64, tpu.core_type = #tpu.core_type<tc>, window_params = [{transform_indices = @transform_0, window_bounds = array<i64: 1, 32, 256>}, {pipeline_mode = #tpu.pipeline_mode<synchronous>, transform_indices = @transform_1, window_bounds = array<i64: 32, 1>}, {pipeline_mode = #tpu.pipeline_mode<synchronous>, transform_indices = @transform_2, window_bounds = array<i64: 32, 1>}, {transform_indices = @transform_3, window_bounds = array<i64: 1, 32, 256>}]} {
    %c0 = arith.constant 0 : index
    %c0_0 = arith.constant 0 : index
    %c0_1 = arith.constant 0 : index
    %0 = vector.load %arg2[%c0, %c0_0, %c0_1] : memref<1x32x256xf32, #tpu.memory_space<vmem>>, vector<1x32x256xf32>
    %1 = vector.shape_cast %0 : vector<1x32x256xf32> to vector<32x256xf32>
    %cst = arith.constant dense<0.000000e+00> : vector<256xf32>
    %2 = vector.multi_reduction <add>, %1, %cst [0] : vector<32x256xf32> to vector<256xf32>
    %3 = vector.shape_cast %2 : vector<256xf32> to vector<1x256xf32>
    %cst_2 = arith.constant 3.200000e+01 : f32
    %4 = vector.broadcast %cst_2 : f32 to vector<1x256xf32>
    %5 = arith.divf %3, %4 : vector<1x256xf32>
    %6 = vector.broadcast %5 : vector<1x256xf32> to vector<32x256xf32>
    %7 = arith.subf %1, %6 : vector<32x256xf32>
    %8 = arith.mulf %7, %7 : vector<32x256xf32>
    %cst_3 = arith.constant dense<0.000000e+00> : vector<256xf32>
    %9 = vector.multi_reduction <add>, %8, %cst_3 [0] : vector<32x256xf32> to vector<256xf32>
    %10 = vector.shape_cast %9 : vector<256xf32> to vector<1x256xf32>
    %cst_4 = arith.constant 3.200000e+01 : f32
    %11 = vector.broadcast %cst_4 : f32 to vector<1x256xf32>
    %12 = arith.divf %10, %11 : vector<1x256xf32>
    %cst_5 = arith.constant 9.99999974E-6 : f32
    %13 = vector.broadcast %cst_5 : f32 to vector<1x256xf32>
    %14 = arith.addf %12, %13 : vector<1x256xf32>
    %15 = math.rsqrt %14 : vector<1x256xf32>
    %16 = vector.broadcast %15 : vector<1x256xf32> to vector<32x256xf32>
    %17 = arith.mulf %7, %16 : vector<32x256xf32>
    %c0_6 = arith.constant 0 : index
    %c0_7 = arith.constant 0 : index
    %18 = vector.load %arg3[%c0_6, %c0_7] : memref<32x1xf32, #tpu.memory_space<vmem>>, vector<32x1xf32>
    %19 = vector.broadcast %18 : vector<32x1xf32> to vector<32x256xf32>
    %20 = arith.mulf %17, %19 : vector<32x256xf32>
    %c0_8 = arith.constant 0 : index
    %c0_9 = arith.constant 0 : index
    %21 = vector.load %arg4[%c0_8, %c0_9] : memref<32x1xf32, #tpu.memory_space<vmem>>, vector<32x1xf32>
    %22 = vector.broadcast %21 : vector<32x1xf32> to vector<32x256xf32>
    %23 = arith.addf %20, %22 : vector<32x256xf32>
    %c0_10 = arith.constant 0 : index
    %c0_11 = arith.constant 0 : index
    %c0_12 = arith.constant 0 : index
    %24 = vector.load %arg5[%c0_10, %c0_11, %c0_12] : memref<1x32x256xf32, #tpu.memory_space<vmem>>, vector<1x32x256xf32>
    %25 = vector.shape_cast %24 : vector<1x32x256xf32> to vector<32x256xf32>
    %26 = vector.shape_cast %23 : vector<32x256xf32> to vector<1x32x256xf32>
    tpu.vector_store %arg5[%c0_10, %c0_11, %c0_12], %26 {strides = array<i32>} : memref<1x32x256xf32, #tpu.memory_space<vmem>>, vector<1x32x256xf32>,
    return
  }
  func.func @transform_0(%arg0: i32, %arg1: i32) -> (i32, i32, i32) {
    %c0_i32 = arith.constant 0 : i32
    %c0_i32_0 = arith.constant 0 : i32
    return %arg0, %c0_i32, %arg1 : i32, i32, i32
  }
  func.func @transform_1(%arg0: i32, %arg1: i32) -> (i32, i32) {
    %c0_i32 = arith.constant 0 : i32
    %c0_i32_0 = arith.constant 0 : i32
    %c0_i32_1 = arith.constant 0 : i32
    return %c0_i32, %c0_i32_0 : i32, i32
  }
  func.func @transform_2(%arg0: i32, %arg1: i32) -> (i32, i32) {
    %c0_i32 = arith.constant 0 : i32
    %c0_i32_0 = arith.constant 0 : i32
    %c0_i32_1 = arith.constant 0 : i32
    return %c0_i32, %c0_i32_0 : i32, i32
  }
  func.func @transform_3(%arg0: i32, %arg1: i32) -> (i32, i32, i32) {
    %c0_i32 = arith.constant 0 : i32
    %c0_i32_0 = arith.constant 0 : i32
    return %arg0, %c0_i32, %arg1 : i32, i32, i32
  }
}

</mosaic_0001>

<bundles_post_ra>
// kernel: layernorm_proxy.1
= control target key start
LH: loop header
LB: loop body
LE: loop exit
PB: predicated region body
PF: predicated region fallthrough
CT: control target
= control target key end

     0   :  { %s535_s12 = smov 0   ;;  %s537_s13 = smov 0   ;;  %s599_s0 = inlined_call_operand.vmem [shape: f32[2,32,256], index: 0, kind: input, shape index: {}]   ;;  %s600_s1 = inlined_call_operand.vmem [shape: f32[32,1], index: 1, kind: input, shape index: {}]   ;;  %s601_s2 = inlined_call_operand.vmem [shape: f32[32,1], index: 2, kind: input, shape index: {}]   ;;  %s602_s3 = inlined_call_operand.vmem [shape: f32[2,32,256], index: 3, kind: output, shape index: {}]  }
   0x1   :  { %s539_s14 = smov 0  }
   0x2 LB: > { %s25_s15 = sadd.s32 1, %s508_s13  ;;  %p450_p0 = scmp.ge.s32.totalorder %s512_s14, 1  ;;  %s512_s14 = sphi %s539_s14, %s13_s14   ;;  %s508_s13 = sphi %s537_s13, %s604_s13   ;;  %s504_s12 = sphi %s535_s12, %s603_s12  }
   0x3   : > { %p27_p1 = scmp.ge.s32.totalorder %s25_s15, 2  ;;  %p158_p2 = scmp.lt.s32.totalorder %s512_s14, 3 }
   0x5   : > { %s606_s15 = smov (%p27_p1, %s25_s15), 0  ;;  %p159_p3 = pnand %p450_p0, %p158_p2 }
   0x6   : > { %v289_v0 = vld [vmem:[%s600_s1 + $0x10] sm:$0xff] (!%p159_p3)  ;;  %v287_v1 = vld [vmem:[%s600_s1] sm:$0xff] (!%p159_p3)  ;;  %v514_v2 = vmov (!%p159_p3), 0   ;;  %v290_v3 = vld [vmem:[%s600_s1 + $0x18] sm:$0xff] (!%p159_p3)  ;;  %p191_p4 = scmp.lt.s32.totalorder (!%p159_p3), %s504_s12, 1 }
   0x7   : > { %162 = sbr.rel (%p159_p3) target bundleno = 152 (0x98), region = 32  ;;  %485 = vset.pattern.permute.xlu1 (!%p159_p3), %v514_v2  ;;  %484 = vset.pattern.permute.xlu0 (!%p159_p3), %v514_v2  ;;  %v288_v4 = vld [vmem:[%s600_s1 + $0x8] sm:$0xff] (!%p159_p3)  ;;  %v319_v6 = vld [vmem:[%s601_s2] sm:$0xff] (!%p159_p3)  ;;  %v322_v7 = vld [vmem:[%s601_s2 + $0x18] sm:$0xff] (!%p159_p3) }
   0x8   : > { %303 = vperm.xlu1 (!%p159_p3), %485, %v289_v0   ;;  %293 = vperm.xlu0 (!%p159_p3), %484, %v287_v1   ;;  %v320_v5 = vld [vmem:[%s601_s2 + $0x8] sm:$0xff] (!%p159_p3)  ;;  %v321_v8 = vld [vmem:[%s601_s2 + $0x10] sm:$0xff] (!%p159_p3) }
   0xc   : > { %308 = vperm.xlu1 (!%p159_p3), %485, %v290_v3   ;;  %298 = vperm.xlu0 (!%p159_p3), %484, %v288_v4  }
   0xe   : > { %s608_s12 = smov (!%p191_p4, %s504_s12), 1 }
   0xf   : > { %s457_s5 = sshll.u32 %s608_s12, 6 }
  0x10   : > { %330 = vperm.xlu1 %485, %v320_v5   ;;  %325 = vperm.xlu0 %484, %v319_v6   ;;  %s198_s8 = scalar_lea.vmem %s599_s0, %s457_s5  ;;  %s208_s11 = scalar_lea.vmem %s602_s3, %s457_s5 }
  0x11   : > { %v210_v9 = vld [vmem:[%s198_s8] sm:$0xff]  ;;  %v212_v10 = vld [vmem:[%s198_s8 + $0x10] sm:$0xff]  ;;  %v211_v11 = vld [vmem:[%s198_s8 + $0x8] sm:$0xff] }
  0x12   : > { %v213_v12 = vld [vmem:[%s198_s8 + $0x18] sm:$0xff]  ;;  %v218_v13 = vadd.f32 %v212_v10, %v210_v9  ;;  %v214_v14 = vld [vmem:[%s198_s8 + $0x20] sm:$0xff]  ;;  %v215_v16 = vld [vmem:[%s198_s8 + $0x28] sm:$0xff] }
  0x13   : > { %v227_v15 = vadd.f32 %v213_v12, %v211_v11  ;;  %v216_v18 = vld [vmem:[%s198_s8 + $0x30] sm:$0xff]  ;;  %v217_v20 = vld [vmem:[%s198_s8 + $0x38] sm:$0xff] }
  0x14   : > { %340 = vperm.xlu1 %485, %v322_v7   ;;  %335 = vperm.xlu0 %484, %v321_v8   ;;  %v219_v17 = vadd.f32 %v218_v13, %v214_v14 }
  0x15   : > { %v228_v19 = vadd.f32 %v227_v15, %v215_v16 }
  0x16   : > { %v220_v21 = vadd.f32 %v219_v17, %v216_v18 }
  0x17   : > { %v229_v22 = vadd.f32 %v228_v19, %v217_v20 }
  0x18   : > { %v221_v23 = vrot.slane %v220_v21, 4 }
  0x19   : > { %v230_v24 = vrot.slane %v229_v22, 4 }
  0x1a   : > { %v222_v25 = vadd.f32 %v221_v23, %v220_v21 }
  0x1b   : > { %v231_v26 = vadd.f32 %v230_v24, %v229_v22 }
  0x1c   : > { %v223_v27 = vrot.slane %v222_v25, 2 }
  0x1d   : > { %v232_v28 = vrot.slane %v231_v26, 2 }
  0x1e   : > { %v224_v29 = vadd.f32 %v223_v27, %v222_v25 }
  0x1f   : > { %v233_v30 = vadd.f32 %v232_v28, %v231_v26 }
  0x20   : > { %v225_v31 = vrot.slane %v224_v29, 1 }
  0x21   : > { %v234_v32 = vrot.slane %v233_v30, 1 }
  0x22   : > { %v226_v33 = vadd.f32 %v225_v31, %v224_v29 }
  0x23   : > { %v235_v34 = vadd.f32 %v234_v32, %v233_v30 }
  0x24   : > { %v237_v35 = vmul.f32 0.03125, %v226_v33 }
  0x25   : > { %v238_v36 = vmul.f32 0.03125, %v235_v34 }
  0x26   : > { %v239_v37 = vsub.f32 %v210_v9, %v237_v35  ;;  %v241_v38 = vsub.f32 %v212_v10, %v237_v35  ;;  %v243_v41 = vsub.f32 %v214_v14, %v237_v35  ;;  %v245_v47 = vsub.f32 %v216_v18, %v237_v35 }
  0x27   : > { %v240_v39 = vsub.f32 %v211_v11, %v238_v36  ;;  %v242_v40 = vsub.f32 %v213_v12, %v238_v36  ;;  %v244_v44 = vsub.f32 %v215_v16, %v238_v36  ;;  %v246_v50 = vsub.f32 %v217_v20, %v238_v36 }
  0x28   : > { %v247_v42 = vmul.f32 %v239_v37, %v239_v37  ;;  %v249_v43 = vmul.f32 %v241_v38, %v241_v38  ;;  %v251_v48 = vmul.f32 %v243_v41, %v243_v41  ;;  %v253_v53 = vmul.f32 %v245_v47, %v245_v47 }
  0x29   : > { %v248_v45 = vmul.f32 %v240_v39, %v240_v39  ;;  %v250_v46 = vmul.f32 %v242_v40, %v242_v40  ;;  %v252_v51 = vmul.f32 %v244_v44, %v244_v44  ;;  %v254_v55 = vmul.f32 %v246_v50, %v246_v50 }
  0x2a   : > { %v255_v49 = vadd.f32 %v249_v43, %v247_v42 }
  0x2b   : > { %v264_v52 = vadd.f32 %v250_v46, %v248_v45 }
  0x2c   : > { %v256_v54 = vadd.f32 %v255_v49, %v251_v48 }
  0x2d   : > { %v265_v56 = vadd.f32 %v264_v52, %v252_v51 }
  0x2e   : > { %v257_v57 = vadd.f32 %v256_v54, %v253_v53 }
  0x2f   : > { %v266_v58 = vadd.f32 %v265_v56, %v254_v55 }
  0x30   : > { %v258_v59 = vrot.slane %v257_v57, 4 }
  0x31   : > { %v267_v60 = vrot.slane %v266_v58, 4 }
  0x32   : > { %v259_v61 = vadd.f32 %v258_v59, %v257_v57 }
  0x33   : > { %v268_v62 = vadd.f32 %v267_v60, %v266_v58 }
  0x34   : > { %v260_v63 = vrot.slane %v259_v61, 2 }
  0x35   : > { %v269_v0 = vrot.slane %v268_v62, 2 }
  0x36   : > { %v261_v1 = vadd.f32 %v260_v63, %v259_v61 }
  0x37   : > { %v270_v2 = vadd.f32 %v269_v0, %v268_v62 }
  0x38   : > { %v262_v3 = vrot.slane %v261_v1, 1 }
  0x39   : > { %v271_v4 = vrot.slane %v270_v2, 1 }
  0x3a   : > { %v263_v5 = vadd.f32 %v262_v3, %v261_v1 }
  0x3b   : > { %v272_v6 = vadd.f32 %v271_v4, %v270_v2 }
  0x3c   : > { %v273_v7 = vmul.f32 0.03125, %v263_v5 }
  0x3d   : > { %v274_v8 = vmul.f32 0.03125, %v272_v6 }
  0x3e   : > { %v275_v9 = vadd.f32 1e-05, %v273_v7 }
  0x3f   : > { %v276_v10 = vadd.f32 1e-05, %v274_v8 }
  0x40   : > { %486 = vrsqrt.f32 %v275_v9 }
  0x41   : > { %488 = vrsqrt.f32 %v276_v10 }
  0x4a   : > { %v487_v11 = vpop.eup %486 }
  0x4b   : > { %v489_v12 = vpop.eup %488  ;;  %v279_v15 = vmul.f32 %v487_v11, %v239_v37  ;;  %v281_v17 = vmul.f32 %v487_v11, %v241_v38  ;;  %v283_v21 = vmul.f32 %v487_v11, %v243_v41  ;;  %v285_v23 = vmul.f32 %v487_v11, %v245_v47 }
  0x4c   : > { %v280_v16 = vmul.f32 %v489_v12, %v240_v39  ;;  %v282_v18 = vmul.f32 %v489_v12, %v242_v40  ;;  %v284_v22 = vmul.f32 %v489_v12, %v244_v44  ;;  %v286_v24 = vmul.f32 %v489_v12, %v246_v50 }
  0x87   : > { %v304_v13 = vpop.permute.xlu1 %303  ;;  %v294_v14 = vpop.permute.xlu0 %293 }
  0x88   : > { %v311_v25 = vmul.f32 %v294_v14, %v279_v15  ;;  %v312_v26 = vmul.f32 %v294_v14, %v280_v16  ;;  %v315_v35 = vmul.f32 %v304_v13, %v283_v21  ;;  %v316_v36 = vmul.f32 %v304_v13, %v284_v22 }
  0x8b   : > { %v309_v19 = vpop.permute.xlu1 %308  ;;  %v299_v20 = vpop.permute.xlu0 %298 }
  0x8c   : > { %v313_v27 = vmul.f32 %v299_v20, %v281_v17  ;;  %v314_v28 = vmul.f32 %v299_v20, %v282_v18  ;;  %v317_v37 = vmul.f32 %v309_v19, %v285_v23  ;;  %v318_v38 = vmul.f32 %v309_v19, %v286_v24 }
  0x8f   : > { %v331_v29 = vpop.permute.xlu1 %330  ;;  %v326_v30 = vpop.permute.xlu0 %325 }
  0x90   : > { %v345_v31 = vadd.f32 %v331_v29, %v313_v27  ;;  %v346_v32 = vadd.f32 %v331_v29, %v314_v28  ;;  %v343_v33 = vadd.f32 %v326_v30, %v311_v25  ;;  %v344_v34 = vadd.f32 %v326_v30, %v312_v26 }
  0x92   : > { %353 = vst [vmem:[%s208_s11 + $0x10] sm:$0xff] %v345_v31  ;;  %354 = vst [vmem:[%s208_s11 + $0x18] sm:$0xff] %v346_v32 }
  0x93   : > { %351 = vst [vmem:[%s208_s11] sm:$0xff] %v343_v33  ;;  %352 = vst [vmem:[%s208_s11 + $0x8] sm:$0xff] %v344_v34  ;;  %v341_v39 = vpop.permute.xlu1 %340  ;;  %v336_v40 = vpop.permute.xlu0 %335 }
  0x94   : > { %v349_v41 = vadd.f32 %v341_v39, %v317_v37  ;;  %v350_v42 = vadd.f32 %v341_v39, %v318_v38  ;;  %v347_v43 = vadd.f32 %v336_v40, %v315_v35  ;;  %v348_v44 = vadd.f32 %v336_v40, %v316_v36 }
  0x96   : > { %357 = vst [vmem:[%s208_s11 + $0x30] sm:$0xff] %v349_v41  ;;  %358 = vst [vmem:[%s208_s11 + $0x38] sm:$0xff] %v350_v42 }
  0x97   : > { %355 = vst [vmem:[%s208_s11 + $0x20] sm:$0xff] %v347_v43  ;;  %356 = vst [vmem:[%s208_s11 + $0x28] sm:$0xff] %v348_v44 }
  0x98 PF: > { %s13_s14 = sadd.s32 1, %s512_s14   ;;  %s603_s12 = smov %s508_s13 }
  0x99   : > { %p10_p5 = scmp.ge.s32.totalorder %s13_s14, 4   ;;  %s604_s13 = smov %s606_s15 }
  0x9b   :  { %12 = sbr.rel (!%p10_p5) target bundleno = 2 (0x2), region = 62 }

</bundles_post_ra>
